<compile_context>
chip_gen: v5e
topology: v5e:2x2
jax: 0.10.0
libtpu: 0.0.40
codegen_flags: <defaults>
</compile_context>

<pallas_src>
import math

import jax
import jax.numpy as jnp
from jax.experimental import pallas as pl
from jax.experimental.pallas import tpu as pltpu


def _round_up(v, m):
    return ((v + m - 1) // m) * m


def gcn_kernel(a_ref, xw1_ref, b1_ref, w2_ref, ma_ref, out_ref, acc_ref):
    # NOTE: all pl.program_id calls live at kernel top level (calling program_id inside a pl.when
    # body is what broke the previous revision's lowering).
    k = pl.program_id(1)
    tk = a_ref.shape[1]

    @pl.when(k == 0)
    def _():
        acc_ref[...] = jnp.zeros_like(acc_ref)

    # Layer-1 propagation with W1 pre-folded: accumulate Â @ (X W1) over source-node K tiles.
    # XW1 is fully VMEM-resident; slice its K block here instead of re-DMA-ing it per row tile.
    acc_ref[...] += jnp.dot(a_ref[...], xw1_ref[pl.ds(k * tk, tk), :],
                            preferred_element_type=jnp.float32)

    @pl.when(k == pl.num_programs(1) - 1)
    def _():
        # H1 = relu(Â X W1 + b1); bias added once per row tile, outside the K loop.
        # (Padded node rows give relu(0 + b1) != 0 when b1 != 0; the zero padded columns of MÂ
        #  mask them out of the readout.)
        h1 = jnp.maximum(acc_ref[...] + b1_ref[...], 0.0)
        # H1 @ W2 for this row tile, then the folded readout: partial (G, C) contribution.
        hw = jnp.dot(h1.astype(jnp.bfloat16), w2_ref[...],
                     preferred_element_type=jnp.float32)
        out_ref[0, :, :] = jnp.dot(ma_ref[...], hw.astype(jnp.bfloat16),
                                   preferred_element_type=jnp.float32)


def gcn_forward(a_hat, x, w1, b1, w2, b2, readout, *, tm=None, tk=None):
    n, _ = x.shape
    h = w1.shape[1]
    c = w2.shape[1]
    g = readout.shape[0]

    # Tile selection: the kernel is HBM-bound streaming dense Â, so favor big tiles (512 reaches
    # ~85% of HBM roofline vs ~29% at 128).  Small-N fast path: run the whole problem as one grid
    # step so the ~0.35 us/step pipeline overhead doesn't dominate tiny graphs (like this demo).
    if tm is None or tk is None:
        n_min = _round_up(n, 128)
        tile = n_min if n_min <= 1024 else 512
        tm = tile if tm is None else tm
        tk = tile if tk is None else tk

    # Lane/sublane-dense padding: feature dims to 128 lanes, graphs to 8 sublanes, nodes to the grid.
    h_pad = _round_up(h, 128)
    c_pad = _round_up(c, 128)
    g_pad = _round_up(g, 8)
    n_pad = _round_up(n, math.lcm(tm, tk))
    n_row_tiles = n_pad // tm
    n_k_tiles = n_pad // tk

    def pad2(arr, rows, cols):
        return jnp.pad(arr, ((0, rows - arr.shape[0]), (0, cols - arr.shape[1])))

    bf16, f32 = jnp.bfloat16, jnp.float32

    # bf16 MXU operands (f32 accumulation happens inside the kernel); b1 stays f32.
    a_p = pad2(a_hat, n_pad, n_pad).astype(bf16)
    # Fold W1 into the wrapper: XW1 = X @ W1 is only N x H and becomes the resident kernel operand.
    xw1_p = pad2(x @ w1, n_pad, h_pad).astype(bf16)
    w2_p = pad2(w2, h_pad, c_pad).astype(bf16)
    b1_p = pad2(b1, 1, h_pad).astype(f32)
    # Fold the mean-nodes readout into layer 2: MÂ = readout @ Â (G, N).  Done against the
    # already-cast bf16 Â so this pre-pass doesn't re-read Â in f32.
    readout_p = pad2(readout, g_pad, n_pad).astype(bf16)
    ma_p = jnp.dot(readout_p, a_p, preferred_element_type=f32).astype(bf16)

    flops = (2 * n_pad * n_pad * h_pad          # Â @ (X W1)
             + 2 * n_pad * h_pad * c_pad        # H1 @ W2
             + 2 * g_pad * n_pad * c_pad)       # MÂ @ (H1 W2)
    bytes_accessed = (a_p.size * 2              # dominant stream: dense Â, read once
                      + xw1_p.size * 2          # resident, read once
                      + ma_p.size * 2           # one (G, tm) slice per row tile
                      + w2_p.size * 2 + b1_p.size * 4
                      + n_row_tiles * g_pad * c_pad * 4)

    # VMEM budget: double-buffered Â tiles + resident XW1/W2/b1/MÂ-slice + f32 accumulator.
    # Cap at 56 MiB so the same config stays inside v7x's 64 MiB physical VMEM per TensorCore.
    vmem_need = (2 * tm * tk * 2
                 + 2 * n_pad * h_pad * 2
                 + 2 * g_pad * tm * 2
                 + 2 * h_pad * c_pad * 2 + 2 * h_pad * 4
                 + 2 * g_pad * c_pad * 4
                 + tm * h_pad * 4)
    vmem_limit = min(max(32 * 1024 * 1024, 2 * vmem_need), 56 * 1024 * 1024)

    partials = pl.pallas_call(
        gcn_kernel,
        out_shape=jax.ShapeDtypeStruct((n_row_tiles, g_pad, c_pad), jnp.float32),
        grid_spec=pltpu.PrefetchScalarGridSpec(
            num_scalar_prefetch=0,
            grid=(n_row_tiles, n_k_tiles),
            in_specs=[
                pl.BlockSpec((tm, tk), lambda i, k: (i, k)),          # Â tile (dst rows, src cols)
                pl.BlockSpec((n_pad, h_pad), lambda i, k: (0, 0)),    # XW1, fully VMEM-resident
                pl.BlockSpec((1, h_pad), lambda i, k: (0, 0)),        # b1 (resident)
                pl.BlockSpec((h_pad, c_pad), lambda i, k: (0, 0)),    # W2 (resident)
                pl.BlockSpec((g_pad, tm), lambda i, k: (0, i)),       # MÂ column slice for row tile i
            ],
            out_specs=pl.BlockSpec((1, g_pad, c_pad), lambda i, k: (i, 0, 0)),
            scratch_shapes=[pltpu.VMEM((tm, h_pad), jnp.float32)],    # f32 accumulator for Â@(XW1)
        ),
        compiler_params=pltpu.CompilerParams(
            # Row-tile axis shards across TensorCores (v7x megacore); K axis is the reduction.
            dimension_semantics=("parallel", "arbitrary"),
            vmem_limit_bytes=vmem_limit,
        ),
        cost_estimate=pl.CostEstimate(flops=flops, transcendentals=0,
                                      bytes_accessed=bytes_accessed),
    )(a_p, xw1_p, b1_p, w2_p, ma_p)

    # Tiny (n_row_tiles, G, C) reduction of the per-row-tile partial readouts; b2 added once here
    # (readout rows sum to 1, so mean_nodes(... + b2) == readout-fold + b2).
    return partials.sum(axis=0)[:g, :c] + b2


def build_normalized_adjacency(num_nodes, src, dst):
    """Dense Â = D_in^{-1/2} A D_out^{-1/2}, degrees clamped to min 1 (DGL semantics)."""
    a = jnp.zeros((num_nodes, num_nodes), jnp.float32)
    a = a.at[dst, src].add(1.0)                    # rows = destination, cols = source
    deg_out = jnp.clip(a.sum(axis=0), 1.0, None)   # out-degree of source nodes
    deg_in = jnp.clip(a.sum(axis=1), 1.0, None)    # in-degree of destination nodes
    return (deg_in ** -0.5)[:, None] * a * (deg_out ** -0.5)[None, :]


def build_readout(graph_ids, num_graphs, num_nodes):
    """M[g, i] = 1 / (#nodes in graph g) if node i belongs to graph g (dgl.mean_nodes)."""
    onehot = (graph_ids[None, :] == jnp.arange(num_graphs)[:, None]).astype(jnp.float32)
    counts = jnp.clip(onehot.sum(axis=1, keepdims=True), 1.0, None)
    return onehot / counts


if __name__ == "__main__":
    key = jax.random.PRNGKey(0)

    # Batched graph (graph classification): 4 bidirectional cycle graphs, 200 nodes total.
    sizes = [40, 56, 48, 56]
    num_nodes = sum(sizes)
    num_graphs = len(sizes)
    in_feats, h_feats, num_classes = 8, 32, 4

    graph_ids = jnp.concatenate(
        [jnp.full((s,), gi, jnp.int32) for gi, s in enumerate(sizes)])
    offsets = [0]
    for s in sizes[:-1]:
        offsets.append(offsets[-1] + s)
    src_list, dst_list = [], []
    for o, s in zip(offsets, sizes):
        idx = jnp.arange(s, dtype=jnp.int32)
        nxt = (idx + 1) % s
        src_list += [idx + o, nxt + o]     # cycle edges in both directions
        dst_list += [nxt + o, idx + o]
    src = jnp.concatenate(src_list)
    dst = jnp.concatenate(dst_list)

    a_hat = build_normalized_adjacency(num_nodes, src, dst)
    readout = build_readout(graph_ids, num_graphs, num_nodes)

    # Deterministic parameter init (Glorot-uniform-like weights, zero biases like DGL GraphConv).
    k_x, k_w1, k_w2 = jax.random.split(key, 3)
    x = jax.random.normal(k_x, (num_nodes, in_feats), dtype=jnp.float32)

    def glorot(k, shape):
        limit = (6.0 / (shape[0] + shape[1])) ** 0.5
        return jax.random.uniform(k, shape, jnp.float32, -limit, limit)

    w1 = glorot(k_w1, (in_feats, h_feats))
    b1 = jnp.zeros((1, h_feats), jnp.float32)
    w2 = glorot(k_w2, (h_feats, num_classes))
    b2 = jnp.zeros((1, num_classes), jnp.float32)

    out = gcn_forward(a_hat, x, w1, b1, w2, b2, readout)
    out = jax.block_until_ready(out)

    bf, f32 = jnp.bfloat16, jnp.float32

    # Reference 1: same math with matching bf16 operands / f32 accumulation (tight check).
    xw1_bf = (x @ w1).astype(bf)
    ax = jnp.dot(a_hat.astype(bf), xw1_bf, preferred_element_type=f32)
    h1_bf = jnp.maximum(ax + b1, 0.0)
    hw_bf = jnp.dot(h1_bf.astype(bf), w2.astype(bf), preferred_element_type=f32)
    ma_bf = jnp.dot(readout.astype(bf), a_hat.astype(bf),
                    preferred_element_type=f32).astype(bf)
    ref_bf = jnp.dot(ma_bf, hw_bf.astype(bf), preferred_element_type=f32) + b2
    assert jnp.allclose(out, ref_bf, atol=1e-2, rtol=1e-2), (out, ref_bf)

    # Reference 2: pure f32 math of the original module (semantic sanity, looser tolerance for bf16).
    h1_ref = jnp.maximum(a_hat @ x @ w1 + b1, 0.0)
    h2_ref = a_hat @ h1_ref @ w2 + b2
    ref_f32 = readout @ h2_ref
    assert jnp.allclose(out, ref_f32, atol=5e-2, rtol=5e-2), (out, ref_f32)

    print("KERNEL_OK")
</pallas_src>

<mosaic_0001>
module attributes {stable_mosaic.version = 11 : i64} {
  func.func @gcn_kernel(%arg0: i32, %arg1: i32, %arg2: memref<256x256xbf16, #tpu.memory_space<vmem>>, %arg3: memref<256x128xbf16, #tpu.memory_space<vmem>>, %arg4: memref<1x128xf32, #tpu.memory_space<vmem>>, %arg5: memref<128x128xbf16, #tpu.memory_space<vmem>>, %arg6: memref<8x256xbf16, #tpu.memory_space<vmem>>, %arg7: memref<1x8x128xf32, #tpu.memory_space<vmem>>, %arg8: memref<256x128xf32, #tpu.memory_space<vmem>>) attributes {dimension_semantics = [#tpu.dimension_semantics<parallel>, #tpu.dimension_semantics<arbitrary>], iteration_bounds = array<i64: 1, 1>, scalar_prefetch = 0 : i64, scratch_operands = 1 : i64, tpu.core_type = #tpu.core_type<tc>, window_params = [{transform_indices = @transform_0, window_bounds = array<i64: 256, 256>}, {pipeline_mode = #tpu.pipeline_mode<synchronous>, transform_indices = @transform_1, window_bounds = array<i64: 256, 128>}, {pipeline_mode = #tpu.pipeline_mode<synchronous>, transform_indices = @transform_2, window_bounds = array<i64: 1, 128>}, {pipeline_mode = #tpu.pipeline_mode<synchronous>, transform_indices = @transform_3, window_bounds = array<i64: 128, 128>}, {transform_indices = @transform_4, window_bounds = array<i64: 8, 256>}, {transform_indices = @transform_5, window_bounds = array<i64: 1, 8, 128>}]} {
    %c0_i32 = arith.constant 0 : i32
    %0 = arith.cmpi eq, %arg1, %c0_i32 : i32
    %1 = arith.extui %0 : i1 to i32
    %c0_i32_0 = arith.constant 0 : i32
    %2 = arith.cmpi ne, %1, %c0_i32_0 : i32
    scf.if %2 {
      %cst_9 = arith.constant 0.000000e+00 : f32
      %14 = vector.broadcast %cst_9 : f32 to vector<256x128xf32>
      %c0_10 = arith.constant 0 : index
      %c0_11 = arith.constant 0 : index
      %15 = vector.load %arg8[%c0_10, %c0_11] : memref<256x128xf32, #tpu.memory_space<vmem>>, vector<256x128xf32>
      tpu.vector_store %arg8[%c0_10, %c0_11], %14 {strides = array<i32>} : memref<256x128xf32, #tpu.memory_space<vmem>>, vector<256x128xf32>,
    } else {
    }
    %c0 = arith.constant 0 : index
    %c0_1 = arith.constant 0 : index
    %3 = vector.load %arg8[%c0, %c0_1] : memref<256x128xf32, #tpu.memory_space<vmem>>, vector<256x128xf32>
    %c0_2 = arith.constant 0 : index
    %c0_3 = arith.constant 0 : index
    %4 = vector.load %arg2[%c0_2, %c0_3] : memref<256x256xbf16, #tpu.memory_space<vmem>>, vector<256x256xbf16>
    %c256_i32 = arith.constant 256 : i32
    %5 = arith.muli %arg1, %c256_i32 : i32
    %6 = arith.index_cast %5 : i32 to index
    %c0_4 = arith.constant 0 : index
    %7 = vector.load %arg3[%6, %c0_4] : memref<256x128xbf16, #tpu.memory_space<vmem>>, vector<256x128xbf16>
    %cst = arith.constant dense<0.000000e+00> : vector<256x128xf32>
    %8 = tpu.matmul %4, %7, %cst {dimension_numbers = #tpu.dot_dimension_numbers<[1], [0], [0], [1], [0, 0, 1, 1], [], []>} : vector<256x256xbf16>, vector<256x128xbf16>, vector<256x128xf32> -> vector<256x128xf32>
    %9 = arith.addf %3, %8 : vector<256x128xf32>
    %c0_5 = arith.constant 0 : index
    %c0_6 = arith.constant 0 : index
    %10 = vector.load %arg8[%c0_5, %c0_6] : memref<256x128xf32, #tpu.memory_space<vmem>>, vector<256x128xf32>
    tpu.vector_store %arg8[%c0_5, %c0_6], %9 {strides = array<i32>} : memref<256x128xf32, #tpu.memory_space<vmem>>, vector<256x128xf32>,
    %c0_i32_7 = arith.constant 0 : i32
    %11 = arith.cmpi eq, %arg1, %c0_i32_7 : i32
    %12 = arith.extui %11 : i1 to i32
    %c0_i32_8 = arith.constant 0 : i32
    %13 = arith.cmpi ne, %12, %c0_i32_8 : i32
    scf.if %13 {
      %c0_9 = arith.constant 0 : index
      %c0_10 = arith.constant 0 : index
      %14 = vector.load %arg8[%c0_9, %c0_10] : memref<256x128xf32, #tpu.memory_space<vmem>>, vector<256x128xf32>
      %c0_11 = arith.constant 0 : index
      %c0_12 = arith.constant 0 : index
      %15 = vector.load %arg4[%c0_11, %c0_12] : memref<1x128xf32, #tpu.memory_space<vmem>>, vector<1x128xf32>
      %16 = vector.broadcast %15 : vector<1x128xf32> to vector<256x128xf32>
      %17 = arith.addf %14, %16 : vector<256x128xf32>
      %cst_13 = arith.constant 0.000000e+00 : f32
      %18 = vector.broadcast %cst_13 : f32 to vector<256x128xf32>
      %19 = arith.maximumf %17, %18 : vector<256x128xf32>
      %20 = arith.truncf %19 : vector<256x128xf32> to vector<256x128xbf16>
      %c0_14 = arith.constant 0 : index
      %c0_15 = arith.constant 0 : index
      %21 = vector.load %arg5[%c0_14, %c0_15] : memref<128x128xbf16, #tpu.memory_space<vmem>>, vector<128x128xbf16>
      %cst_16 = arith.constant dense<0.000000e+00> : vector<256x128xf32>
      %22 = tpu.matmul %20, %21, %cst_16 {dimension_numbers = #tpu.dot_dimension_numbers<[1], [0], [0], [1], [0, 0, 1, 1], [], []>} : vector<256x128xbf16>, vector<128x128xbf16>, vector<256x128xf32> -> vector<256x128xf32>
      %c0_17 = arith.constant 0 : index
      %c0_18 = arith.constant 0 : index
      %23 = vector.load %arg6[%c0_17, %c0_18] : memref<8x256xbf16, #tpu.memory_space<vmem>>, vector<8x256xbf16>
      %24 = arith.truncf %22 : vector<256x128xf32> to vector<256x128xbf16>
      %cst_19 = arith.constant dense<0.000000e+00> : vector<8x128xf32>
      %25 = tpu.matmul %23, %24, %cst_19 {dimension_numbers = #tpu.dot_dimension_numbers<[1], [0], [0], [1], [0, 0, 1, 1], [], []>} : vector<8x256xbf16>, vector<256x128xbf16>, vector<8x128xf32> -> vector<8x128xf32>
      %c0_20 = arith.constant 0 : index
      %c0_21 = arith.constant 0 : index
      %c0_22 = arith.constant 0 : index
      %26 = vector.load %arg7[%c0_20, %c0_21, %c0_22] : memref<1x8x128xf32, #tpu.memory_space<vmem>>, vector<1x8x128xf32>
      %27 = vector.shape_cast %26 : vector<1x8x128xf32> to vector<8x128xf32>
      %28 = vector.shape_cast %25 : vector<8x128xf32> to vector<1x8x128xf32>
      tpu.vector_store %arg7[%c0_20, %c0_21, %c0_22], %28 {strides = array<i32>} : memref<1x8x128xf32, #tpu.memory_space<vmem>>, vector<1x8x128xf32>,
    } else {
    }
    return
  }
  func.func @transform_0(%arg0: i32, %arg1: i32) -> (i32, i32) {
    %c0_i32 = arith.constant 0 : i32
    return %arg0, %arg1 : i32, i32
  }
  func.func @transform_1(%arg0: i32, %arg1: i32) -> (i32, i32) {
    %c0_i32 = arith.constant 0 : i32
    %c0_i32_0 = arith.constant 0 : i32
    %c0_i32_1 = arith.constant 0 : i32
    return %c0_i32, %c0_i32_0 : i32, i32
  }
  func.func @transform_2(%arg0: i32, %arg1: i32) -> (i32, i32) {
    %c0_i32 = arith.constant 0 : i32
    %c0_i32_0 = arith.constant 0 : i32
    %c0_i32_1 = arith.constant 0 : i32
    return %c0_i32, %c0_i32_0 : i32, i32
  }
  func.func @transform_3(%arg0: i32, %arg1: i32) -> (i32, i32) {
    %c0_i32 = arith.constant 0 : i32
    %c0_i32_0 = arith.constant 0 : i32
    %c0_i32_1 = arith.constant 0 : i32
    return %c0_i32, %c0_i32_0 : i32, i32
  }
  func.func @transform_4(%arg0: i32, %arg1: i32) -> (i32, i32) {
    %c0_i32 = arith.constant 0 : i32
    %c0_i32_0 = arith.constant 0 : i32
    return %c0_i32, %arg0 : i32, i32
  }
  func.func @transform_5(%arg0: i32, %arg1: i32) -> (i32, i32, i32) {
    %c0_i32 = arith.constant 0 : i32
    %c0_i32_0 = arith.constant 0 : i32
    %c0_i32_1 = arith.constant 0 : i32
    return %arg0, %c0_i32, %c0_i32_0 : i32, i32, i32
  }
}

</mosaic_0001>

<bundles_post_ra>
// kernel: tpu_custom_call.1
= control target key start
LH: loop header
LB: loop body
LE: loop exit
PB: predicated region body
PF: predicated region fallthrough
CT: control target
= control target key end

     0   :  { %10 = vsyncpa [#allocation4], 0  ;;  %s1627_s0 = inlined_call_operand.hbm [shape: bf16[256,256], index: 0, kind: input, shape index: {}]   ;;  %s1628_s1 = inlined_call_operand.hbm [shape: bf16[256,128], index: 1, kind: input, shape index: {}]   ;;  %s1629_s2 = inlined_call_operand.vmem [shape: f32[1,128], index: 2, kind: input, shape index: {}]   ;;  %s1630_s3 = inlined_call_operand.hbm [shape: bf16[128,128], index: 3, kind: input, shape index: {}]   ;;  %s1631_s4 = inlined_call_operand.hbm [shape: bf16[8,256], index: 4, kind: input, shape index: {}]   ;;  %s1632_s5 = inlined_call_operand.hbm [shape: f32[1,8,128], index: 5, kind: output, shape index: {}]  }
   0x1   :  { %11 = vsyncpa [#allocation7], 0 }
   0x2   :  { %12 = vsyncpa [#allocation10], 0  ;;  %s31_s20 = sshll.u32 %s1628_s1, 4  ;;  %s32_s20 = int_to_ptr.hbm [resolvable:$true] %s31_s20 }
   0x3   :  { %13 = vsyncpa [#allocation5], 0  ;;  %s1503_s21 = smov [#allocation6]   ;;  %s18_s25 = sshll.u32 %s1627_s0, 4  ;;  %s19_s25 = int_to_ptr.hbm [resolvable:$true] %s18_s25 }
   0x4   :  { %s33_s22 = sshll.u32 %s1503_s21, 4  ;;  %s1504_s26 = smov 64   ;;  %s34_s22 = int_to_ptr.vmem [resolvable:$true] %s33_s22 }
   0x5   :  { %s1505_s27 = smov 4   ;;  %s1506_s28 = smov [#allocation3]  }
   0x6   :  { %39 = dma.hbm_to_vmem [thread:$0]  %s32_s20, 2048, %s34_s22, [#allocation7], %s1504_s26, %s1504_s26, %s1505_s27  }
   0x7   :  { %s20_s29 = sshll.u32 %s1506_s28, 4  ;;  %s1507_s30 = smov 128   ;;  %s21_s29 = int_to_ptr.vmem [resolvable:$true] %s20_s29 }
   0x8   :  { %s1508_s6 = smov 8   ;;  %s46_s8 = sshll.u32 %s1630_s3, 4  ;;  %s47_s8 = int_to_ptr.hbm [resolvable:$true] %s46_s8 }
   0x9   :  { %26 = dma.hbm_to_vmem [thread:$0]  %s19_s25, 4096, %s21_s29, [#allocation4], %s1507_s30, %s1507_s30, %s1508_s6  }
   0xa   :  { %s1509_s9 = smov [#allocation8]   ;;  %s60_s12 = sshll.u32 %s1631_s4, 4  ;;  %s61_s12 = int_to_ptr.hbm [resolvable:$true] %s60_s12 }
   0xb   :  { %s48_s10 = sshll.u32 %s1509_s9, 4  ;;  %s1510_s13 = smov [#allocation9]   ;;  %s49_s10 = int_to_ptr.vmem [resolvable:$true] %s48_s10 }
   0xc   :  { %54 = dma.hbm_to_vmem [thread:$0]  %s47_s8, 1024, %s49_s10, [#allocation7], %s1504_s26, %s1504_s26, %s1505_s27  }
   0xd   :  { %s62_s14 = sshll.u32 %s1510_s13, 4  ;;  %s63_s14 = int_to_ptr.vmem [resolvable:$true] %s62_s14 }
   0xe   :  { %65 = dma.hbm_to_vmem [thread:$0]  %s61_s12, 128, %s63_s14, [#allocation10]  }
   0xf   :  { %1495 = dma.done.wait [#allocation4], 4096  }
  0x10   :  { %1496 = vsyncadd [#allocation4], 4294963200 }
  0x11   :  { %1497 = dma.done.wait [#allocation7], 3072  }
  0x12   :  { %1498 = vsyncadd [#allocation7], 4294964224 }
  0x13   :  { %1499 = dma.done.wait [#allocation10], 128  }
  0x14   :  { %1500 = vsyncadd [#allocation10], 4294967168  ;;  %v1324_v0 = vld [vmem:[#allocation6 + $0x38] sm:$0xff]  ;;  %v1323_v2 = vld [vmem:[#allocation6 + $0x30] sm:$0xff]  ;;  %s1047_s18 = sshll.u32 %s1632_s5, 4  ;;  %s1048_s18 = int_to_ptr.hbm [resolvable:$true] %s1047_s18 }
  0x15   :  { %v1332_v1 = vld [vmem:[#allocation6 + $0x78] sm:$0xff]  ;;  %475 = vmatpush.bf16.msra.mxu0 %v1324_v0  ;;  %v1331_v3 = vld [vmem:[#allocation6 + $0x70] sm:$0xff]  ;;  %1341 = vmatpush.bf16.msra.mxu3 %v1324_v0  ;;  %v1322_v4 = vld [vmem:[#allocation6 + $0x28] sm:$0xff] }
  0x16   :  { %564 = vmatpush.bf16.msra.mxu1 %v1332_v1  ;;  %v1330_v5 = vld [vmem:[#allocation6 + $0x68] sm:$0xff]  ;;  %v1321_v6 = vld [vmem:[#allocation6 + $0x20] sm:$0xff]  ;;  %v1320_v8 = vld [vmem:[#allocation6 + $0x18] sm:$0xff] }
  0x17   :  { %v1329_v7 = vld [vmem:[#allocation6 + $0x60] sm:$0xff]  ;;  %v1328_v9 = vld [vmem:[#allocation6 + $0x58] sm:$0xff]  ;;  %v1319_v10 = vld [vmem:[#allocation6 + $0x10] sm:$0xff] }
  0x18   :  { %v1327_v11 = vld [vmem:[#allocation6 + $0x50] sm:$0xff]  ;;  %v1318_v12 = vld [vmem:[#allocation6 + $0x8] sm:$0xff]  ;;  %v1317_v14 = vld [vmem:[#allocation6] sm:$0xff] }
  0x19   :  { %476 = vmatpush.bf16.msra.mxu0 %v1323_v2  ;;  %1342 = vmatpush.bf16.msra.mxu3 %v1323_v2  ;;  %v1326_v13 = vld [vmem:[#allocation6 + $0x48] sm:$0xff]  ;;  %v1325_v15 = vld [vmem:[#allocation6 + $0x40] sm:$0xff]  ;;  %v1167_v20 = vld [vmem:[#allocation3 + $0xd0] sm:$0xf] }
  0x1a   :  { %565 = vmatpush.bf16.msra.mxu1 %v1331_v3  ;;  %v1063_v16 = vld [vmem:[#allocation3] sm:$0xf]  ;;  %v1286_v17 = vld [vmem:[#allocation3 + $0x4] sm:$0xf0]  ;;  %v1285_v18 = vld [vmem:[#allocation3 + $0x4] sm:$0xf] }
  0x1b   :  { %v1065_v19 = vld [vmem:[#allocation3 + $0x8] sm:$0xf0]  ;;  %v1312_v21 = vld [vmem:[#allocation3 + $0xd4] sm:$0xf0]  ;;  %v1064_v22 = vor.u32 %v1286_v17, %v1063_v16  ;;  %v1071_v25 = vld [vmem:[#allocation3 + $0x10] sm:$0xf] }
  0x1c   :  { %v1068_v23 = vor.u32 %v1285_v18, %v1065_v19  ;;  %v1168_v24 = vor.u32 %v1312_v21, %v1167_v20  ;;  %v1288_v26 = vld [vmem:[#allocation3 + $0x14] sm:$0xf0]  ;;  %v1287_v27 = vld [vmem:[#allocation3 + $0x14] sm:$0xf]  ;;  %v1073_v28 = vld [vmem:[#allocation3 + $0x18] sm:$0xf0] }
  0x1d   :  { %477 = vmatpush.bf16.msra.mxu0 %v1322_v4  ;;  %1343 = vmatpush.bf16.msra.mxu3 %v1322_v4  ;;  %v1175_v29 = vld [vmem:[#allocation3 + $0xe0] sm:$0xf]  ;;  %v1314_v30 = vld [vmem:[#allocation3 + $0xe4] sm:$0xf0]  ;;  %v1072_v31 = vor.u32 %v1288_v26, %v1071_v25  ;;  %v1076_v32 = vor.u32 %v1287_v27, %v1073_v28  ;;  %v1289_v36 = vld [vmem:[#allocation3 + $0x24] sm:$0xf] }
  0x1e   :  { %566 = vmatpush.bf16.msra.mxu1 %v1330_v5  ;;  %v1176_v33 = vor.u32 %v1314_v30, %v1175_v29  ;;  %v1079_v34 = vld [vmem:[#allocation3 + $0x20] sm:$0xf]  ;;  %v1290_v35 = vld [vmem:[#allocation3 + $0x24] sm:$0xf0]  ;;  %v1081_v37 = vld [vmem:[#allocation3 + $0x28] sm:$0xf0] }
  0x1f   :  { %v1183_v38 = vld [vmem:[#allocation3 + $0xf0] sm:$0xf]  ;;  %v1316_v39 = vld [vmem:[#allocation3 + $0xf4] sm:$0xf0]  ;;  %v1080_v40 = vor.u32 %v1290_v35, %v1079_v34  ;;  %v1084_v41 = vor.u32 %v1289_v36, %v1081_v37  ;;  %v1291_v45 = vld [vmem:[#allocation3 + $0x34] sm:$0xf] }
  0x20   :  { %v1184_v42 = vor.u32 %v1316_v39, %v1183_v38  ;;  %v1087_v43 = vld [vmem:[#allocation3 + $0x30] sm:$0xf]  ;;  %v1292_v44 = vld [vmem:[#allocation3 + $0x34] sm:$0xf0]  ;;  %v1089_v46 = vld [vmem:[#allocation3 + $0x38] sm:$0xf0] }
  0x21   :  { %478 = vmatpush.bf16.msra.mxu0 %v1321_v6  ;;  %1344 = vmatpush.bf16.msra.mxu3 %v1321_v6  ;;  %v1311_v47 = vld [vmem:[#allocation3 + $0xd4] sm:$0xf]  ;;  %v1169_v48 = vld [vmem:[#allocation3 + $0xd8] sm:$0xf0]  ;;  %v1088_v49 = vor.u32 %v1292_v44, %v1087_v43  ;;  %v1092_v50 = vor.u32 %v1291_v45, %v1089_v46  ;;  %v1095_v52 = vld [vmem:[#allocation3 + $0x40] sm:$0xf] }
  0x22   :  { %567 = vmatpush.bf16.msra.mxu1 %v1329_v7  ;;  %v1172_v51 = vor.u32 %v1311_v47, %v1169_v48  ;;  %v1294_v53 = vld [vmem:[#allocation3 + $0x44] sm:$0xf0]  ;;  %v1293_v54 = vld [vmem:[#allocation3 + $0x44] sm:$0xf]  ;;  %v1097_v55 = vld [vmem:[#allocation3 + $0x48] sm:$0xf0] }
  0x23   :  { %v1313_v56 = vld [vmem:[#allocation3 + $0xe4] sm:$0xf]  ;;  %v1177_v57 = vld [vmem:[#allocation3 + $0xe8] sm:$0xf0]  ;;  %v1096_v58 = vor.u32 %v1294_v53, %v1095_v52  ;;  %v1100_v59 = vor.u32 %v1293_v54, %v1097_v55  ;;  %v1340_v61 = vld [vmem:[#allocation8 + $0x38] sm:$0xff] }
  0x24   :  { %v1180_v60 = vor.u32 %v1313_v56, %v1177_v57  ;;  %900 = vmatpush.bf16.msra.mxu2 %v1340_v61  ;;  %v1103_v62 = vld [vmem:[#allocation3 + $0x50] sm:$0xf]  ;;  %v1296_v63 = vld [vmem:[#allocation3 + $0x54] sm:$0xf0]  ;;  %v1295_v0 = vld [vmem:[#allocation3 + $0x54] sm:$0xf] }
  0x25   :  { %479 = vmatpush.bf16.msra.mxu0 %v1320_v8  ;;  %1345 = vmatpush.bf16.msra.mxu3 %v1320_v8  ;;  %v1315_v2 = vld [vmem:[#allocation3 + $0xf4] sm:$0xf]  ;;  %v1104_v4 = vor.u32 %v1296_v63, %v1103_v62  ;;  %v1338_v8 = vld [vmem:[#allocation8 + $0x28] sm:$0xff]  ;;  %v1336_v16 = vld [vmem:[#allocation8 + $0x18] sm:$0xff] }
  0x26   :  { %568 = vmatpush.bf16.msra.mxu1 %v1328_v9  ;;  %v1335_v17 = vld [vmem:[#allocation8 + $0x10] sm:$0xff]  ;;  %v1334_v18 = vld [vmem:[#allocation8 + $0x8] sm:$0xff]  ;;  %v1333_v20 = vld [vmem:[#allocation8] sm:$0xff] }
  0x27   :  { %v1119_v19 = vld [vmem:[#allocation3 + $0x70] sm:$0xf]  ;;  %v1300_v21 = vld [vmem:[#allocation3 + $0x74] sm:$0xf0]  ;;  %v1127_v26 = vld [vmem:[#allocation3 + $0x80] sm:$0xf] }
  0x28   :  { %v1302_v27 = vld [vmem:[#allocation3 + $0x84] sm:$0xf0]  ;;  %v1301_v28 = vld [vmem:[#allocation3 + $0x84] sm:$0xf]  ;;  %v1129_v29 = vld [vmem:[#allocation3 + $0x88] sm:$0xf0] }
  0x29   :  { %480 = vmatpush.bf16.msra.mxu0 %v1319_v10  ;;  %1346 = vmatpush.bf16.msra.mxu3 %v1319_v10  ;;  %v1111_v10 = vld [vmem:[#allocation3 + $0x60] sm:$0xf]  ;;  %v1128_v30 = vor.u32 %v1302_v27, %v1127_v26  ;;  %v1304_v43 = vld [vmem:[#allocation3 + $0x94] sm:$0xf0]  ;;  %v1303_v44 = vld [vmem:[#allocation3 + $0x94] sm:$0xf] }
  0x2a   :  { %569 = vmatpush.bf16.msra.mxu1 %v1327_v11  ;;  %v1557_v35 = vld [vmem:[%s1629_s2] ss:$0 sm:$0xff]  ;;  %v1137_v45 = vld [vmem:[#allocation3 + $0x98] sm:$0xf0]  ;;  %v1306_v62 = vld [vmem:[#allocation3 + $0xa4] sm:$0xf0] }
  0x2b   :  { %v1305_v63 = vld [vmem:[#allocation3 + $0xa4] sm:$0xf]  ;;  %s1511_s2 = smov [#allocation11]  }
  0x2c   :  { %s1045_s15 = sshll.u32 %s1511_s2, 4  ;;  %s1046_s15 = int_to_ptr.vmem [resolvable:$true] %s1045_s15 }
  0x2d   :  { %481 = vmatpush.bf16.msra.mxu0 %v1318_v12  ;;  %1347 = vmatpush.bf16.msra.mxu3 %v1318_v12  ;;  %v1297_v12 = vld [vmem:[#allocation3 + $0x64] sm:$0xf] }
  0x2e   :  { %570 = vmatpush.bf16.msra.mxu1 %v1326_v13 }
  0x31   :  { %482 = vmatpush.bf16.msra.mxu0 %v1317_v14  ;;  %1348 = vmatpush.bf16.msra.mxu3 %v1317_v14 }
  0x32   :  { %571 = vmatpush.bf16.msra.mxu1 %v1325_v15 }
  0x34   :  { %483 = vmatmul.bf16.vlgmr.msra.gmra.mxu0 %v1064_v22  ;;  %548 = vmatmul.bf16.vlgmr.msra.gmra.mxu3 %v1168_v24  ;;  %v1299_v22 = vld [vmem:[#allocation3 + $0x74] sm:$0xf]  ;;  %v1120_v24 = vor.u32 %v1300_v21, %v1119_v19  ;;  %v1153_v19 = vld [vmem:[#allocation3 + $0xb8] sm:$0xf0] }
  0x35   :  { %1349 = vmatpush.bf16.msrb.mxu3 %v1332_v1  ;;  %572 = vmatmul.bf16.vlgmr.msra.gmra.mxu1 %v1068_v23  ;;  %v1105_v1 = vld [vmem:[#allocation3 + $0x58] sm:$0xf0] }
  0x36   :  { %v1121_v23 = vld [vmem:[#allocation3 + $0x78] sm:$0xf0] }
  0x37   :  { %v1124_v25 = vor.u32 %v1299_v22, %v1121_v23 }
  0x39   :  { %1350 = vmatpush.bf16.msrb.mxu3 %v1331_v3  ;;  %v1185_v3 = vld [vmem:[#allocation3 + $0xf8] sm:$0xf0] }
  0x3a   :  { %v1188_v6 = vor.u32 %v1315_v2, %v1185_v3 }
  0x3d   :  { %1351 = vmatpush.bf16.msrb.mxu3 %v1330_v5  ;;  %v1108_v5 = vor.u32 %v1295_v0, %v1105_v1  ;;  %v1145_v0 = vld [vmem:[#allocation3 + $0xa8] sm:$0xf0] }
  0x41   :  { %1352 = vmatpush.bf16.msrb.mxu3 %v1329_v7  ;;  %v1339_v7 = vld [vmem:[#allocation8 + $0x30] sm:$0xff] }
  0x42   :  { %901 = vmatpush.bf16.msra.mxu2 %v1339_v7 }
  0x44   :  { %488 = vmatmul.bf16.gmra.mxu0 %v1072_v31  ;;  %553 = vmatmul.bf16.gmra.mxu3 %v1176_v33  ;;  %v1132_v31 = vor.u32 %v1301_v28, %v1129_v29 }
  0x45   :  { %1353 = vmatpush.bf16.msrb.mxu3 %v1328_v9  ;;  %577 = vmatmul.bf16.gmra.mxu1 %v1076_v32  ;;  %v1337_v9 = vld [vmem:[#allocation8 + $0x20] sm:$0xff] }
  0x46   :  { %902 = vmatpush.bf16.msra.mxu2 %v1338_v8 }
  0x49   :  { %1354 = vmatpush.bf16.msrb.mxu3 %v1327_v11  ;;  %v1298_v11 = vld [vmem:[#allocation3 + $0x64] sm:$0xf0] }
  0x4a   :  { %903 = vmatpush.bf16.msra.mxu2 %v1337_v9  ;;  %v1112_v14 = vor.u32 %v1298_v11, %v1111_v10 }
  0x4d   :  { %1355 = vmatpush.bf16.msrb.mxu3 %v1326_v13  ;;  %v1113_v13 = vld [vmem:[#allocation3 + $0x68] sm:$0xf0] }
  0x4e   :  { %904 = vmatpush.bf16.msra.mxu2 %v1336_v16 }
  0x51   :  { %1356 = vmatpush.bf16.msrb.mxu3 %v1325_v15  ;;  %v1116_v15 = vor.u32 %v1297_v12, %v1113_v13 }
  0x52   :  { %905 = vmatpush.bf16.msra.mxu2 %v1335_v17 }
  0x54   :  { %493 = vmatmul.bf16.gmra.mxu0 %v1080_v40  ;;  %558 = vmatmul.bf16.gmra.mxu3 %v1184_v42  ;;  %v1135_v42 = vld [vmem:[#allocation3 + $0x90] sm:$0xf] }
  0x55   :  { %582 = vmatmul.bf16.gmra.mxu1 %v1084_v41  ;;  %1357 = vmatpush.bf16.msra.mxu3 %v1340_v61  ;;  %v1143_v61 = vld [vmem:[#allocation3 + $0xa0] sm:$0xf] }
  0x56   :  { %906 = vmatpush.bf16.msra.mxu2 %v1334_v18 }
  0x59   :  { %1358 = vmatpush.bf16.msra.mxu3 %v1339_v7 }
  0x5a   :  { %907 = vmatpush.bf16.msra.mxu2 %v1333_v20 }
  0x5d   :  { %1359 = vmatpush.bf16.msra.mxu3 %v1338_v8 }
  0x61   :  { %1360 = vmatpush.bf16.msra.mxu3 %v1337_v9 }
  0x64   :  { %498 = vmatmul.bf16.gmra.mxu0 %v1088_v49  ;;  %637 = vmatmul.bf16.vlgmr.msrb.gmra.mxu3 %v1172_v51  ;;  %v1136_v49 = vor.u32 %v1304_v43, %v1135_v42 }
  0x65   :  { %587 = vmatmul.bf16.gmra.mxu1 %v1092_v50  ;;  %1361 = vmatpush.bf16.msra.mxu3 %v1336_v16  ;;  %v1140_v50 = vor.u32 %v1303_v44, %v1137_v45  ;;  %v1151_v16 = vld [vmem:[#allocation3 + $0xb0] sm:$0xf] }
  0x69   :  { %1362 = vmatpush.bf16.msra.mxu3 %v1335_v17  ;;  %v1308_v17 = vld [vmem:[#allocation3 + $0xb4] sm:$0xf0] }
  0x6a   :  { %v1152_v23 = vor.u32 %v1308_v17, %v1151_v16 }
  0x6d   :  { %1363 = vmatpush.bf16.msra.mxu3 %v1334_v18  ;;  %v1307_v18 = vld [vmem:[#allocation3 + $0xb4] sm:$0xf] }
  0x71   :  { %1364 = vmatpush.bf16.msra.mxu3 %v1333_v20 }
  0x74   :  { %503 = vmatmul.bf16.gmra.mxu0 %v1096_v58  ;;  %642 = vmatmul.bf16.gmra.mxu3 %v1180_v60 }
  0x75   :  { %592 = vmatmul.bf16.gmra.mxu1 %v1100_v59 }
  0x84   :  { %508 = vmatmul.bf16.gmra.mxu0 %v1104_v4  ;;  %647 = vmatmul.bf16.gmra.mxu3 %v1188_v6  ;;  %v1144_v4 = vor.u32 %v1306_v62, %v1143_v61 }
  0x85   :  { %597 = vmatmul.bf16.gmra.mxu1 %v1108_v5  ;;  %v1148_v5 = vor.u32 %v1305_v63, %v1145_v0 }
  0x94   :  { %513 = vmatmul.bf16.gmra.mxu0 %v1112_v14 }
  0x95   :  { %602 = vmatmul.bf16.gmra.mxu1 %v1116_v15 }
  0xa4   :  { %518 = vmatmul.bf16.gmra.mxu0 %v1120_v24  ;;  %v1156_v24 = vor.u32 %v1307_v18, %v1153_v19 }
  0xa5   :  { %607 = vmatmul.bf16.gmra.mxu1 %v1124_v25 }
  0xb1   :  { %v484_v32 = vpop.f32.mrf.mxu0 }
  0xb2   :  { %v573_v33 = vpop.f32.mrf.mxu1 }
  0xb3   :  { %v574_v34 = vadd.f32 %v573_v33, %v484_v32 }
  0xb4   :  { %523 = vmatmul.bf16.gmra.mxu0 %v1128_v30 }
  0xb5   :  { %612 = vmatmul.bf16.gmra.mxu1 %v1132_v31  ;;  %v756_v39 = vadd.f32 %v1557_v35, %v574_v34 }
  0xb7   :  { %v1559_v36 = vpop.f32.mrf.mxu3  ;;  %v788_v46 = vmax.f32 %v756_v39, 0.0  ;;  %v1310_v39 = vld [vmem:[#allocation3 + $0xc4] sm:$0xf0] }
  0xb9   :  { %v486_v37 = vpop.f32.mrf.mxu0 }
  0xba   :  { %v575_v38 = vpop.f32.mrf.mxu1 }
  0xbb   :  { %v576_v40 = vadd.f32 %v575_v38, %v486_v37  ;;  %v1159_v38 = vld [vmem:[#allocation3 + $0xc0] sm:$0xf] }
  0xbd   :  { %v757_v41 = vadd.f32 %v1557_v35, %v576_v40  ;;  %v1309_v40 = vld [vmem:[#allocation3 + $0xc4] sm:$0xf] }
  0xbf   :  { %v789_v47 = vmax.f32 %v757_v41, 0.0  ;;  %v1563_v51 = vpop.f32.mrf.mxu3  ;;  %v1161_v41 = vld [vmem:[#allocation3 + $0xc8] sm:$0xf0] }
  0xc1   :  { %v820_v48 = vpack.c.bf16 %v789_v47, %v788_v46  ;;  %v489_v52 = vpop.f32.mrf.mxu0  ;;  %v1160_v46 = vor.u32 %v1310_v39, %v1159_v38  ;;  %v1164_v47 = vor.u32 %v1309_v40, %v1161_v41 }
  0xc2   :  { %v578_v53 = vpop.f32.mrf.mxu1 }
  0xc3   :  { %908 = vmatmul.bf16.vlgmr.msra.gmra.mxu2 %v820_v48  ;;  %v579_v54 = vadd.f32 %v578_v53, %v489_v52 }
  0xc4   :  { %528 = vmatmul.bf16.gmra.mxu0 %v1136_v49 }
  0xc5   :  { %617 = vmatmul.bf16.gmra.mxu1 %v1140_v50  ;;  %v758_v58 = vadd.f32 %v1557_v35, %v579_v54 }
  0xc7   :  { %v1565_v55 = vpop.f32.mrf.mxu3  ;;  %v790_v1 = vmax.f32 %v758_v58, 0.0 }
  0xc9   :  { %v491_v56 = vpop.f32.mrf.mxu0 }
  0xca   :  { %v580_v57 = vpop.f32.mrf.mxu1 }
  0xcb   :  { %v581_v59 = vadd.f32 %v580_v57, %v491_v56 }
  0xcd   :  { %v759_v60 = vadd.f32 %v1557_v35, %v581_v59 }
  0xcf   :  { %v791_v2 = vmax.f32 %v759_v60, 0.0  ;;  %v1569_v6 = vpop.f32.mrf.mxu3 }
  0xd1   :  { %v821_v3 = vpack.c.bf16 %v791_v2, %v790_v1  ;;  %v494_v7 = vpop.f32.mrf.mxu0 }
  0xd2   :  { %v583_v8 = vpop.f32.mrf.mxu1 }
  0xd3   :  { %913 = vmatmul.bf16.gmra.mxu2 %v821_v3  ;;  %v584_v9 = vadd.f32 %v583_v8, %v494_v7 }
  0xd4   :  { %533 = vmatmul.bf16.gmra.mxu0 %v1144_v4 }
  0xd5   :  { %622 = vmatmul.bf16.gmra.mxu1 %v1148_v5  ;;  %v760_v13 = vadd.f32 %v1557_v35, %v584_v9 }
  0xd7   :  { %v1571_v10 = vpop.f32.mrf.mxu3  ;;  %v792_v20 = vmax.f32 %v760_v13, 0.0 }
  0xd9   :  { %v496_v11 = vpop.f32.mrf.mxu0 }
  0xda   :  { %v585_v12 = vpop.f32.mrf.mxu1 }
  0xdb   :  { %v586_v14 = vadd.f32 %v585_v12, %v496_v11 }
  0xdd   :  { %v761_v15 = vadd.f32 %v1557_v35, %v586_v14 }
  0xdf   :  { %v793_v21 = vmax.f32 %v761_v15, 0.0  ;;  %v1575_v25 = vpop.f32.mrf.mxu3 }
  0xe1   :  { %v822_v22 = vpack.c.bf16 %v793_v21, %v792_v20  ;;  %v499_v26 = vpop.f32.mrf.mxu0 }
  0xe2   :  { %v588_v27 = vpop.f32.mrf.mxu1 }
  0xe3   :  { %918 = vmatmul.bf16.gmra.mxu2 %v822_v22  ;;  %v589_v28 = vadd.f32 %v588_v27, %v499_v26 }
  0xe4   :  { %538 = vmatmul.bf16.gmra.mxu0 %v1152_v23 }
  0xe5   :  { %627 = vmatmul.bf16.gmra.mxu1 %v1156_v24  ;;  %v762_v32 = vadd.f32 %v1557_v35, %v589_v28 }
  0xe7   :  { %v638_v29 = vpop.f32.mrf.mxu3  ;;  %v794_v42 = vmax.f32 %v762_v32, 0.0 }
  0xe8   :  { %v639_v34 = vadd.f32 %v638_v29, %v1559_v36 }
  0xe9   :  { %v501_v30 = vpop.f32.mrf.mxu0 }
  0xea   :  { %v590_v31 = vpop.f32.mrf.mxu1  ;;  %v782_v44 = vadd.f32 %v1557_v35, %v639_v34 }
  0xeb   :  { %v591_v33 = vadd.f32 %v590_v31, %v501_v30 }
  0xec   :  { %v814_v36 = vmax.f32 %v782_v44, 0.0 }
  0xed   :  { %v763_v37 = vadd.f32 %v1557_v35, %v591_v33 }
  0xef   :  { %v795_v43 = vmax.f32 %v763_v37, 0.0  ;;  %v640_v48 = vpop.f32.mrf.mxu3 }
  0xf0   :  { %v641_v52 = vadd.f32 %v640_v48, %v1563_v51 }
  0xf1   :  { %v823_v45 = vpack.c.bf16 %v795_v43, %v794_v42  ;;  %v504_v49 = vpop.f32.mrf.mxu0 }
  0xf2   :  { %v593_v50 = vpop.f32.mrf.mxu1  ;;  %v783_v53 = vadd.f32 %v1557_v35, %v641_v52 }
  0xf3   :  { %923 = vmatmul.bf16.gmra.mxu2 %v823_v45  ;;  %v594_v56 = vadd.f32 %v593_v50, %v504_v49 }
  0xf4   :  { %543 = vmatmul.bf16.gmra.mxu0 %v1160_v46  ;;  %v815_v54 = vmax.f32 %v783_v53, 0.0 }
  0xf5   :  { %632 = vmatmul.bf16.gmra.mxu1 %v1164_v47  ;;  %v764_v61 = vadd.f32 %v1557_v35, %v594_v56 }
  0xf6   :  { %v833_v57 = vpack.c.bf16 %v815_v54, %v814_v36 }
  0xf7   :  { %v643_v58 = vpop.f32.mrf.mxu3  ;;  %v796_v0 = vmax.f32 %v764_v61, 0.0 }
  0xf8   :  { %973 = vmatmul.bf16.vlgmr.msra.gmra.mxu3 %v833_v57  ;;  %v644_v63 = vadd.f32 %v643_v58, %v1565_v55 }
  0xf9   :  { %v506_v59 = vpop.f32.mrf.mxu0 }
  0xfa   :  { %v595_v60 = vpop.f32.mrf.mxu1  ;;  %v784_v2 = vadd.f32 %v1557_v35, %v644_v63 }
  0xfb   :  { %v596_v62 = vadd.f32 %v595_v60, %v506_v59 }
  0xfc   :  { %v816_v9 = vmax.f32 %v784_v2, 0.0 }
  0xfd   :  { %v765_v51 = vadd.f32 %v1557_v35, %v596_v62 }
  0xff   :  { %v797_v1 = vmax.f32 %v765_v51, 0.0  ;;  %v645_v4 = vpop.f32.mrf.mxu3 }
 0x100   :  { %v646_v8 = vadd.f32 %v645_v4, %v1569_v6 }
 0x101   :  { %v824_v3 = vpack.c.bf16 %v797_v1, %v796_v0  ;;  %v509_v5 = vpop.f32.mrf.mxu0 }
 0x102   :  { %v598_v7 = vpop.f32.mrf.mxu1  ;;  %v785_v11 = vadd.f32 %v1557_v35, %v646_v8 }
 0x103   :  { %928 = vmatmul.bf16.gmra.mxu2 %v824_v3  ;;  %v599_v13 = vadd.f32 %v598_v7, %v509_v5 }
 0x104   :  { %v817_v12 = vmax.f32 %v785_v11, 0.0 }
 0x105   :  { %v766_v17 = vadd.f32 %v1557_v35, %v599_v13 }
 0x106   :  { %v834_v14 = vpack.c.bf16 %v817_v12, %v816_v9 }
 0x107   :  { %v648_v55 = vpop.f32.mrf.mxu3  ;;  %v798_v21 = vmax.f32 %v766_v17, 0.0 }
 0x108   :  { %978 = vmatmul.bf16.gmra.mxu3 %v834_v14  ;;  %v649_v19 = vadd.f32 %v648_v55, %v1571_v10 }
 0x109   :  { %v511_v15 = vpop.f32.mrf.mxu0 }
 0x10a   :  { %v600_v16 = vpop.f32.mrf.mxu1  ;;  %v786_v22 = vadd.f32 %v1557_v35, %v649_v19 }
 0x10b   :  { %v601_v18 = vadd.f32 %v600_v16, %v511_v15 }
 0x10c   :  { %v818_v29 = vmax.f32 %v786_v22, 0.0 }
 0x10d   :  { %v767_v20 = vadd.f32 %v1557_v35, %v601_v18 }
 0x10f   :  { %v799_v6 = vmax.f32 %v767_v20, 0.0  ;;  %v650_v24 = vpop.f32.mrf.mxu3 }
 0x110   :  { %v651_v28 = vadd.f32 %v650_v24, %v1575_v25 }
 0x111   :  { %v825_v23 = vpack.c.bf16 %v799_v6, %v798_v21  ;;  %v514_v26 = vpop.f32.mrf.mxu0 }
 0x112   :  { %v603_v27 = vpop.f32.mrf.mxu1  ;;  %v787_v30 = vadd.f32 %v1557_v35, %v651_v28 }
 0x113   :  { %933 = vmatmul.bf16.gmra.mxu2 %v825_v23  ;;  %v604_v32 = vadd.f32 %v603_v27, %v514_v26 }
 0x114   :  { %v819_v31 = vmax.f32 %v787_v30, 0.0 }
 0x115   :  { %v768_v37 = vadd.f32 %v1557_v35, %v604_v32 }
 0x116   :  { %v835_v33 = vpack.c.bf16 %v819_v31, %v818_v29 }
 0x117   :  { %v800_v40 = vmax.f32 %v768_v37, 0.0 }
 0x118   :  { %983 = vmatmul.bf16.gmra.mxu3 %v835_v33 }
 0x119   :  { %v516_v10 = vpop.f32.mrf.mxu0 }
 0x11a   :  { %v605_v34 = vpop.f32.mrf.mxu1 }
 0x11b   :  { %v606_v38 = vadd.f32 %v605_v34, %v516_v10 }
 0x11d   :  { %v769_v39 = vadd.f32 %v1557_v35, %v606_v38 }
 0x11f   :  { %v801_v41 = vmax.f32 %v769_v39, 0.0 }
 0x121   :  { %v826_v42 = vpack.c.bf16 %v801_v41, %v800_v40  ;;  %v519_v43 = vpop.f32.mrf.mxu0 }
 0x122   :  { %v608_v25 = vpop.f32.mrf.mxu1 }
 0x123   :  { %938 = vmatmul.bf16.gmra.mxu2 %v826_v42  ;;  %v609_v44 = vadd.f32 %v608_v25, %v519_v43 }
 0x125   :  { %v770_v47 = vadd.f32 %v1557_v35, %v609_v44 }
 0x127   :  { %v802_v50 = vmax.f32 %v770_v47, 0.0 }
 0x129   :  { %v521_v45 = vpop.f32.mrf.mxu0 }
 0x12a   :  { %v610_v46 = vpop.f32.mrf.mxu1 }
 0x12b   :  { %v611_v48 = vadd.f32 %v610_v46, %v521_v45 }
 0x12d   :  { %v771_v49 = vadd.f32 %v1557_v35, %v611_v48 }
 0x12f   :  { %v803_v52 = vmax.f32 %v771_v49, 0.0 }
 0x131   :  { %v827_v36 = vpack.c.bf16 %v803_v52, %v802_v50  ;;  %v524_v53 = vpop.f32.mrf.mxu0 }
 0x132   :  { %v613_v54 = vpop.f32.mrf.mxu1 }
 0x133   :  { %943 = vmatmul.bf16.gmra.mxu2 %v827_v36  ;;  %v614_v56 = vadd.f32 %v613_v54, %v524_v53 }
 0x135   :  { %v772_v59 = vadd.f32 %v1557_v35, %v614_v56 }
 0x137   :  { %v804_v62 = vmax.f32 %v772_v59, 0.0 }
 0x139   :  { %v526_v57 = vpop.f32.mrf.mxu0 }
 0x13a   :  { %v615_v58 = vpop.f32.mrf.mxu1 }
 0x13b   :  { %v616_v60 = vadd.f32 %v615_v58, %v526_v57 }
 0x13d   :  { %v773_v61 = vadd.f32 %v1557_v35, %v616_v60 }
 0x13f   :  { %v805_v63 = vmax.f32 %v773_v61, 0.0 }
 0x141   :  { %v828_v51 = vpack.c.bf16 %v805_v63, %v804_v62  ;;  %v529_v0 = vpop.f32.mrf.mxu0 }
 0x142   :  { %v618_v1 = vpop.f32.mrf.mxu1 }
 0x143   :  { %948 = vmatmul.bf16.gmra.mxu2 %v828_v51  ;;  %v619_v3 = vadd.f32 %v618_v1, %v529_v0 }
 0x145   :  { %v774_v7 = vadd.f32 %v1557_v35, %v619_v3 }
 0x146   :  { %v1601_v2 = vpop.f32.mrf.mxu2 }
 0x147   :  { %v806_v12 = vmax.f32 %v774_v7, 0.0 }
 0x149   :  { %v531_v4 = vpop.f32.mrf.mxu0 }
 0x14a   :  { %v620_v5 = vpop.f32.mrf.mxu1 }
 0x14b   :  { %v621_v8 = vadd.f32 %v620_v5, %v531_v4 }
 0x14d   :  { %v775_v9 = vadd.f32 %v1557_v35, %v621_v8 }
 0x14e   :  { %v1605_v11 = vpop.f32.mrf.mxu2 }
 0x14f   :  { %v807_v13 = vmax.f32 %v775_v9, 0.0  ;;  %v990_v14 = vpack.c.bf16 %v1605_v11, %v1601_v2 }
 0x151   :  { %v829_v55 = vpack.c.bf16 %v807_v13, %v806_v12  ;;  %v534_v15 = vpop.f32.mrf.mxu0 }
 0x152   :  { %v623_v16 = vpop.f32.mrf.mxu1 }
 0x153   :  { %953 = vmatmul.bf16.gmra.mxu2 %v829_v55  ;;  %v624_v18 = vadd.f32 %v623_v16, %v534_v15 }
 0x155   :  { %v776_v21 = vadd.f32 %v1557_v35, %v624_v18 }
 0x156   :  { %v1609_v17 = vpop.f32.mrf.mxu2 }
 0x157   :  { %v808_v24 = vmax.f32 %v776_v21, 0.0 }
 0x159   :  { %v536_v19 = vpop.f32.mrf.mxu0 }
 0x15a   :  { %v625_v20 = vpop.f32.mrf.mxu1 }
 0x15b   :  { %v626_v6 = vadd.f32 %v625_v20, %v536_v19 }
 0x15d   :  { %v777_v22 = vadd.f32 %v1557_v35, %v626_v6 }
 0x15e   :  { %v1613_v23 = vpop.f32.mrf.mxu2 }
 0x15f   :  { %v809_v26 = vmax.f32 %v777_v22, 0.0  ;;  %v991_v27 = vpack.c.bf16 %v1613_v23, %v1609_v17  ;;  %v989_v22 = vld [vmem:[#allocation9] sm:$0xff] }
 0x160   :  { %v1007_v23 = vunpack.c.l.b16 %v989_v22 }
 0x161   :  { %v830_v28 = vpack.c.bf16 %v809_v26, %v808_v24  ;;  %v539_v29 = vpop.f32.mrf.mxu0 }
 0x162   :  { %v628_v30 = vpop.f32.mrf.mxu1  ;;  %v1009_v24 = vpack.c.b16 %v1007_v23, %v1007_v23 }
 0x163   :  { %958 = vmatmul.bf16.gmra.mxu2 %v830_v28  ;;  %v629_v32 = vadd.f32 %v628_v30, %v539_v29 }
 0x165   :  { %v778_v34 = vadd.f32 %v1557_v35, %v629_v32  ;;  %v1008_v32 = vunpack.c.h.b16 %v989_v22 }
 0x166   :  { %v919_v31 = vpop.f32.mrf.mxu2 }
 0x167   :  { %v810_v40 = vmax.f32 %v778_v34, 0.0 }
 0x169   :  { %v541_v33 = vpop.f32.mrf.mxu0 }
 0x16a   :  { %v630_v10 = vpop.f32.mrf.mxu1 }
 0x16b   :  { %v631_v37 = vadd.f32 %v630_v10, %v541_v33  ;;  %v1010_v33 = vpack.c.b16 %v1008_v32, %v1008_v32 }
 0x16d   :  { %v779_v38 = vadd.f32 %v1557_v35, %v631_v37 }
 0x16e   :  { %v921_v39 = vpop.f32.mrf.mxu2 }
 0x16f   :  { %v811_v41 = vmax.f32 %v779_v38, 0.0  ;;  %v992_v42 = vpack.c.bf16 %v921_v39, %v919_v31 }
 0x171   :  { %v831_v43 = vpack.c.bf16 %v811_v41, %v810_v40  ;;  %v544_v25 = vpop.f32.mrf.mxu0 }
 0x172   :  { %v633_v44 = vpop.f32.mrf.mxu1 }
 0x173   :  { %963 = vmatmul.bf16.gmra.mxu2 %v831_v43  ;;  %v634_v46 = vadd.f32 %v633_v44, %v544_v25 }
 0x175   :  { %v780_v49 = vadd.f32 %v1557_v35, %v634_v46 }
 0x176   :  { %v924_v45 = vpop.f32.mrf.mxu2 }
 0x177   :  { %v812_v53 = vmax.f32 %v780_v49, 0.0 }
 0x179   :  { %v546_v47 = vpop.f32.mrf.mxu0 }
 0x17a   :  { %v635_v48 = vpop.f32.mrf.mxu1 }
 0x17b   :  { %v636_v50 = vadd.f32 %v635_v48, %v546_v47  ;;  %v974_v63 = vpop.f32.mrf.mxu3 }
 0x17d   :  { %v781_v52 = vadd.f32 %v1557_v35, %v636_v50 }
 0x17e   :  { %v926_v36 = vpop.f32.mrf.mxu2 }
 0x17f   :  { %v813_v54 = vmax.f32 %v781_v52, 0.0  ;;  %v993_v56 = vpack.c.bf16 %v926_v36, %v924_v45 }
 0x181   :  { %v832_v57 = vpack.c.bf16 %v813_v54, %v812_v53 }
 0x183   :  { %968 = vmatmul.bf16.gmra.mxu2 %v832_v57  ;;  %v976_v0 = vpop.f32.mrf.mxu3 }
 0x184   :  { %v1003_v21 = vpack.c.bf16 %v976_v0, %v974_v63 }
 0x186   :  { %v929_v58 = vpop.f32.mrf.mxu2 }
 0x18b   :  { %v979_v3 = vpop.f32.mrf.mxu3 }
 0x18e   :  { %v931_v59 = vpop.f32.mrf.mxu2 }
 0x18f   :  { %v994_v12 = vpack.c.bf16 %v931_v59, %v929_v58 }
 0x193   :  { %v981_v7 = vpop.f32.mrf.mxu3 }
 0x194   :  { %v1004_v20 = vpack.c.bf16 %v981_v7, %v979_v3 }
 0x196   :  { %v934_v60 = vpop.f32.mrf.mxu2 }
 0x19b   :  { %v984_v55 = vpop.f32.mrf.mxu3 }
 0x19e   :  { %v936_v61 = vpop.f32.mrf.mxu2 }
 0x19f   :  { %v995_v9 = vpack.c.bf16 %v936_v61, %v934_v60 }
 0x1a3   :  { %v986_v17 = vpop.f32.mrf.mxu3 }
 0x1a4   :  { %v1005_v18 = vpack.c.bf16 %v986_v17, %v984_v55 }
 0x1a6   :  { %v939_v62 = vpop.f32.mrf.mxu2 }
 0x1ae   :  { %v941_v51 = vpop.f32.mrf.mxu2 }
 0x1af   :  { %v996_v35 = vpack.c.bf16 %v941_v51, %v939_v62 }
 0x1b6   :  { %v944_v1 = vpop.f32.mrf.mxu2 }
 0x1be   :  { %v946_v4 = vpop.f32.mrf.mxu2 }
 0x1bf   :  { %v997_v5 = vpack.c.bf16 %v946_v4, %v944_v1 }
 0x1c1   :  { %1013 = vmatpush.bf16.msrb.mxu3 %v997_v5 }
 0x1c5   :  { %1014 = vmatpush.bf16.msrb.mxu3 %v996_v35 }
 0x1c6   :  { %v949_v8 = vpop.f32.mrf.mxu2 }
 0x1c9   :  { %1015 = vmatpush.bf16.msrb.mxu3 %v995_v9 }
 0x1cd   :  { %1016 = vmatpush.bf16.msrb.mxu3 %v994_v12 }
 0x1ce   :  { %v951_v13 = vpop.f32.mrf.mxu2 }
 0x1cf   :  { %v998_v15 = vpack.c.bf16 %v951_v13, %v949_v8 }
 0x1d1   :  { %1017 = vmatpush.bf16.msrb.mxu3 %v993_v56 }
 0x1d5   :  { %1018 = vmatpush.bf16.msrb.mxu3 %v992_v42 }
 0x1d6   :  { %v954_v16 = vpop.f32.mrf.mxu2 }
 0x1d9   :  { %1019 = vmatpush.bf16.msrb.mxu3 %v991_v27 }
 0x1dd   :  { %1020 = vmatpush.bf16.msrb.mxu3 %v990_v14 }
 0x1de   :  { %v956_v19 = vpop.f32.mrf.mxu2 }
 0x1df   :  { %v999_v14 = vpack.c.bf16 %v956_v19, %v954_v16 }
 0x1e0   :  { %1021 = vmatmul.bf16.vlgmr.msrb.gmra.mxu3 %v1009_v24 }
 0x1e1   :  { %1026 = vmatpush.bf16.msra.mxu3 %v1005_v18 }
 0x1e5   :  { %1027 = vmatpush.bf16.msra.mxu3 %v1004_v20 }
 0x1e6   :  { %v959_v6 = vpop.f32.mrf.mxu2 }
 0x1e9   :  { %1028 = vmatpush.bf16.msra.mxu3 %v1003_v21 }
 0x1ee   :  { %v961_v26 = vpop.f32.mrf.mxu2 }
 0x1ef   :  { %v1000_v11 = vpack.c.bf16 %v961_v26, %v959_v6 }
 0x1f6   :  { %v964_v28 = vpop.f32.mrf.mxu2 }
 0x1fe   :  { %v966_v29 = vpop.f32.mrf.mxu2 }
 0x1ff   :  { %v1001_v2 = vpack.c.bf16 %v966_v29, %v964_v28 }
 0x206   :  { %v969_v27 = vpop.f32.mrf.mxu2 }
 0x20e   :  { %v971_v30 = vpop.f32.mrf.mxu2 }
 0x20f   :  { %v1002_v31 = vpack.c.bf16 %v971_v30, %v969_v27 }
 0x211   :  { %1029 = vmatpush.bf16.msra.mxu3 %v1002_v31 }
 0x215   :  { %1030 = vmatpush.bf16.msra.mxu3 %v1001_v2 }
 0x219   :  { %1031 = vmatpush.bf16.msra.mxu3 %v1000_v11 }
 0x21d   :  { %1032 = vmatpush.bf16.msra.mxu3 %v999_v14 }
 0x221   :  { %1033 = vmatpush.bf16.msra.mxu3 %v998_v15 }
 0x224   :  { %1034 = vmatmul.bf16.vlgmr.msra.gmra.mxu3 %v1010_v33 }
 0x263   :  { %v1022_v10 = vpop.f32.mrf.mxu3 }
 0x26b   :  { %v1024_v34 = vpop.f32.mrf.mxu3 }
 0x2a7   :  { %v1035_v37 = vpop.f32.mrf.mxu3 }
 0x2a8   :  { %v1036_v38 = vadd.f32 %v1035_v37, %v1022_v10 }
 0x2aa   :  { %1039 = vst [vmem:[#allocation11] sm:$0xff] %v1036_v38 }
 0x2ab   :  { %1050 = dma.vmem_to_hbm [thread:$0]  %s1046_s15, 128, %s1048_s18, [#allocation5]  }
 0x2af   :  { %v1037_v39 = vpop.f32.mrf.mxu3 }
 0x2b0   :  { %1501 = dma.done.wait [#allocation5], 128  }
 0x2b1   :  { %1502 = vsyncadd [#allocation5], 4294967168 }
 0x2b2   :  { %1055 = vsyncpa [#allocation4], 1 }
 0x2b3   :  { %1056 = vsyncpa [#allocation7], 1 }
 0x2b4   :  { %1057 = vsyncpa [#allocation10], 1 }
 0x2b5   :  { %1058 = vsyncpa [#allocation5], 1 }

</bundles_post_ra>
